<compile_context>
chip_gen: v7x
topology: tpu7x:2x2x1
jax: 0.10.0
libtpu: 0.0.40
codegen_flags: <defaults>
</compile_context>

<pallas_src>
import math
import jax
import jax.numpy as jnp
from jax.experimental import pallas as pl
from jax.experimental.pallas import tpu as pltpu

P_DROP = 0.2


def _hash_u32(x):
    # "lowbias32" integer hash -- pure uint32 VPU ops (xor / shift / mul).
    x = (x ^ (x >> 16)) * jnp.uint32(0x7FEB352D)
    x = (x ^ (x >> 15)) * jnp.uint32(0x846CA68B)
    x = x ^ (x >> 16)
    return x


def _discriminator_kernel(ctl_ref, x_ref, w1_ref, b1_ref, w2_ref, b2_ref, o_ref):
    # ctl_ref: (2,) int32 SMEM -> [seed, drop_threshold] (threshold==0 => keep all)
    # x_ref:   (3, TB)  VMEM   (batch on lanes)
    # w1_ref:  (H, 3)   VMEM
    # b1_ref:  (H, 1)   VMEM
    # w2_ref:  (H, 1)   VMEM   (already scaled by 1/(1-p) when training)
    # b2_ref:  (1, 1)   VMEM
    # o_ref:   (1, TB)  VMEM
    x = x_ref[...]
    w1 = w1_ref[...]

    # ---- hidden = relu(W1 @ x + b1): K=3 unrolled as VPU broadcast FMAs (no MXU) ----
    h = (w1[:, 0:1] * x[0:1, :]
         + w1[:, 1:2] * x[1:2, :]
         + w1[:, 2:3] * x[2:3, :])
    h = jnp.maximum(h + b1_ref[...], 0.0)

    # ---- dropout(p=0.2): counter-based hash PRNG, keep element iff bits >= threshold ----
    # TODO(synk): bit pattern differs from torch's RNG stream; keep-prob (0.8) and the
    # 1/0.8 scaling (folded into w2) match nn.Dropout(p=0.2).train() semantics.
    H, TB = h.shape
    seed_u = ctl_ref[0].astype(jnp.uint32)
    thresh_u = ctl_ref[1].astype(jnp.uint32)
    row = jax.lax.broadcasted_iota(jnp.int32, (H, TB), 0).astype(jnp.uint32)
    col = jax.lax.broadcasted_iota(jnp.int32, (H, TB), 1).astype(jnp.uint32)
    tile = pl.program_id(0).astype(jnp.uint32)
    elem = (col + tile * jnp.uint32(TB)) * jnp.uint32(H) + row  # unique global element id
    bits = _hash_u32(elem ^ (seed_u * jnp.uint32(2654435761)))
    h = jnp.where(bits >= thresh_u, h, 0.0)

    # ---- out = sum_H(w2 * h) + b2: elementwise mul + sublane reduce (no MXU) ----
    out = jnp.sum(h * w2_ref[...], axis=0, keepdims=True) + b2_ref[...]
    o_ref[...] = out.astype(o_ref.dtype)


def discriminator_forward(x, w1, b1, w2, b2, seed=0, *, training=True, block_b=128):
    """Forward pass of the Discriminator.

    x:  (B, 3) float32
    w1: (H, 3), b1: (H,), w2: (1, H), b2: (1,)   -- PyTorch nn.Linear layout
    Returns (B, 1) float32.
    block_b: batch tile (lane) width, multiple of 128; raise it (e.g. 8192+) for
             large batches to amortize per-step overhead (keep v7x's 64 MiB VMEM in mind).
    """
    B = x.shape[0]
    H = w1.shape[0]
    block_b = max(128, int(block_b))
    n_tiles = -(-B // block_b)
    B_pad = n_tiles * block_b

    # Lane-dense layout: batch on the last (lane) dimension, padded to the tile width.
    xt = jnp.zeros((3, B_pad), jnp.float32).at[:, :B].set(jnp.asarray(x, jnp.float32).T)
    w1k = jnp.asarray(w1, jnp.float32).reshape(H, 3)
    b1k = jnp.asarray(b1, jnp.float32).reshape(H, 1)
    scale = (1.0 / (1.0 - P_DROP)) if training else 1.0
    w2k = jnp.asarray(w2, jnp.float32).reshape(H, 1) * scale   # fold dropout scale into w2
    b2k = jnp.asarray(b2, jnp.float32).reshape(1, 1)

    # drop element iff hash_bits < threshold; threshold=0 in eval -> keep everything.
    threshold = int(round(P_DROP * (2 ** 32))) if training else 0
    ctl = jnp.array([int(seed), threshold], dtype=jnp.int32)

    out_t = pl.pallas_call(
        _discriminator_kernel,
        out_shape=jax.ShapeDtypeStruct((1, B_pad), jnp.float32),
        grid=(n_tiles,),
        in_specs=[
            pl.BlockSpec(memory_space=pltpu.SMEM),            # ctl: [seed, threshold]
            pl.BlockSpec((3, block_b), lambda i: (0, i)),     # x   (batch tiled on lanes)
            pl.BlockSpec((H, 3), lambda i: (0, 0)),           # w1  (VMEM-resident)
            pl.BlockSpec((H, 1), lambda i: (0, 0)),           # b1
            pl.BlockSpec((H, 1), lambda i: (0, 0)),           # w2  (dropout scale folded in)
            pl.BlockSpec((1, 1), lambda i: (0, 0)),           # b2
        ],
        out_specs=pl.BlockSpec((1, block_b), lambda i: (0, i)),
        compiler_params=pltpu.CompilerParams(
            dimension_semantics=("parallel",)),
    )(ctl, xt, w1k, b1k, w2k, b2k)

    return out_t[:, :B].T  # (B, 1)


def init_params(hidden_size, key):
    """Deterministic init mimicking nn.Linear default (U(-1/sqrt(fan_in), +)),
    in PyTorch layout: w1 (H,3), b1 (H,), w2 (1,H), b2 (1,)."""
    k1, k2, k3, k4 = jax.random.split(key, 4)
    bound1 = 1.0 / math.sqrt(3.0)
    bound2 = 1.0 / math.sqrt(hidden_size)
    w1 = jax.random.uniform(k1, (hidden_size, 3), jnp.float32, -bound1, bound1)
    b1 = jax.random.uniform(k2, (hidden_size,), jnp.float32, -bound1, bound1)
    w2 = jax.random.uniform(k3, (1, hidden_size), jnp.float32, -bound2, bound2)
    b2 = jax.random.uniform(k4, (1,), jnp.float32, -bound2, bound2)
    return w1, b1, w2, b2


if __name__ == "__main__":
    key = jax.random.PRNGKey(0)
    k_params, k_x = jax.random.split(key)

    hidden_size = 32
    batch = 200  # exercises padding up to the 128-wide batch tile

    w1, b1, w2, b2 = init_params(hidden_size, k_params)
    x = jax.random.normal(k_x, (batch, 3), dtype=jnp.float32)

    # Eval mode (dropout off): compare against a pure-jnp reference.
    out_eval = discriminator_forward(x, w1, b1, w2, b2, seed=0, training=False)
    out_eval = jax.block_until_ready(out_eval)
    ref = jnp.maximum(x @ w1.T + b1, 0.0) @ w2.T + b2
    assert out_eval.shape == (batch, 1) and out_eval.dtype == jnp.float32
    assert float(jnp.max(jnp.abs(out_eval - ref))) < 1e-4, "mismatch vs reference"

    # Training mode (dropout p=0.2 active, inverted scaling).
    out_train = discriminator_forward(x, w1, b1, w2, b2, seed=123, training=True)
    out_train = jax.block_until_ready(out_train)
    assert out_train.shape == (batch, 1) and out_train.dtype == jnp.float32

    print("KERNEL_OK")
</pallas_src>

<mosaic_0001>
module attributes {stable_mosaic.version = 11 : i64} {
  func.func @_discriminator_kernel(%arg0: i32, %arg1: memref<2xi32, #tpu.memory_space<smem>>, %arg2: memref<3x128xf32, #tpu.memory_space<vmem>>, %arg3: memref<32x3xf32, #tpu.memory_space<vmem>>, %arg4: memref<32x1xf32, #tpu.memory_space<vmem>>, %arg5: memref<32x1xf32, #tpu.memory_space<vmem>>, %arg6: memref<1x1xf32, #tpu.memory_space<vmem>>, %arg7: memref<1x128xf32, #tpu.memory_space<vmem>>) attributes {dimension_semantics = [#tpu.dimension_semantics<parallel>], iteration_bounds = array<i64: 2>, scalar_prefetch = 0 : i64, scratch_operands = 0 : i64, tpu.core_type = #tpu.core_type<tc>, window_params = [{transform_indices = @transform_0, window_bounds = array<i64: 2>}, {transform_indices = @transform_1, window_bounds = array<i64: 3, 128>}, {pipeline_mode = #tpu.pipeline_mode<synchronous>, transform_indices = @transform_2, window_bounds = array<i64: 32, 3>}, {pipeline_mode = #tpu.pipeline_mode<synchronous>, transform_indices = @transform_3, window_bounds = array<i64: 32, 1>}, {pipeline_mode = #tpu.pipeline_mode<synchronous>, transform_indices = @transform_4, window_bounds = array<i64: 32, 1>}, {pipeline_mode = #tpu.pipeline_mode<synchronous>, transform_indices = @transform_5, window_bounds = array<i64: 1, 1>}, {transform_indices = @transform_6, window_bounds = array<i64: 1, 128>}]} {
    %c0 = arith.constant 0 : index
    %c0_0 = arith.constant 0 : index
    %0 = vector.load %arg2[%c0, %c0_0] : memref<3x128xf32, #tpu.memory_space<vmem>>, vector<3x128xf32>
    %c0_1 = arith.constant 0 : index
    %c0_2 = arith.constant 0 : index
    %1 = vector.load %arg3[%c0_1, %c0_2] : memref<32x3xf32, #tpu.memory_space<vmem>>, vector<32x3xf32>
    %2 = vector.extract_strided_slice %1 {offsets = [0, 0], sizes = [32, 1], strides = [1, 1]} : vector<32x3xf32> to vector<32x1xf32>
    %3 = vector.extract_strided_slice %0 {offsets = [0, 0], sizes = [1, 128], strides = [1, 1]} : vector<3x128xf32> to vector<1x128xf32>
    %4 = vector.broadcast %2 : vector<32x1xf32> to vector<32x128xf32>
    %5 = vector.broadcast %3 : vector<1x128xf32> to vector<32x128xf32>
    %6 = arith.mulf %4, %5 : vector<32x128xf32>
    %7 = vector.extract_strided_slice %1 {offsets = [0, 1], sizes = [32, 1], strides = [1, 1]} : vector<32x3xf32> to vector<32x1xf32>
    %8 = vector.extract_strided_slice %0 {offsets = [1, 0], sizes = [1, 128], strides = [1, 1]} : vector<3x128xf32> to vector<1x128xf32>
    %9 = vector.broadcast %7 : vector<32x1xf32> to vector<32x128xf32>
    %10 = vector.broadcast %8 : vector<1x128xf32> to vector<32x128xf32>
    %11 = arith.mulf %9, %10 : vector<32x128xf32>
    %12 = arith.addf %6, %11 : vector<32x128xf32>
    %13 = vector.extract_strided_slice %1 {offsets = [0, 2], sizes = [32, 1], strides = [1, 1]} : vector<32x3xf32> to vector<32x1xf32>
    %14 = vector.extract_strided_slice %0 {offsets = [2, 0], sizes = [1, 128], strides = [1, 1]} : vector<3x128xf32> to vector<1x128xf32>
    %15 = vector.broadcast %13 : vector<32x1xf32> to vector<32x128xf32>
    %16 = vector.broadcast %14 : vector<1x128xf32> to vector<32x128xf32>
    %17 = arith.mulf %15, %16 : vector<32x128xf32>
    %18 = arith.addf %12, %17 : vector<32x128xf32>
    %c0_3 = arith.constant 0 : index
    %c0_4 = arith.constant 0 : index
    %19 = vector.load %arg4[%c0_3, %c0_4] : memref<32x1xf32, #tpu.memory_space<vmem>>, vector<32x1xf32>
    %20 = vector.broadcast %19 : vector<32x1xf32> to vector<32x128xf32>
    %21 = arith.addf %18, %20 : vector<32x128xf32>
    %cst = arith.constant 0.000000e+00 : f32
    %22 = vector.broadcast %cst : f32 to vector<32x128xf32>
    %23 = arith.maximumf %21, %22 : vector<32x128xf32>
    %c0_5 = arith.constant 0 : index
    %24 = memref.load %arg1[%c0_5] : memref<2xi32, #tpu.memory_space<smem>>
    %c1 = arith.constant 1 : index
    %25 = memref.load %arg1[%c1] : memref<2xi32, #tpu.memory_space<smem>>
    %26 = tpu.iota {dimensions = array<i32: 0>} : vector<32x128xi32>
    %27 = tpu.iota {dimensions = array<i32: 1>} : vector<32x128xi32>
    %c128_i32 = arith.constant 128 : i32
    %28 = arith.muli %arg0, %c128_i32 : i32
    %29 = vector.broadcast %28 : i32 to vector<32x128xi32>
    %30 = arith.addi %27, %29 : vector<32x128xi32>
    %c32_i32 = arith.constant 32 : i32
    %31 = vector.broadcast %c32_i32 : i32 to vector<32x128xi32>
    %32 = arith.muli %30, %31 : vector<32x128xi32>
    %33 = arith.addi %32, %26 : vector<32x128xi32>
    %c-1640531535_i32 = arith.constant -1640531535 : i32
    %34 = arith.muli %24, %c-1640531535_i32 : i32
    %35 = vector.broadcast %34 : i32 to vector<32x128xi32>
    %36 = arith.xori %33, %35 : vector<32x128xi32>
    %c16_i32 = arith.constant 16 : i32
    %37 = vector.broadcast %c16_i32 : i32 to vector<32x128xi32>
    %38 = arith.shrui %36, %37 : vector<32x128xi32>
    %39 = arith.xori %36, %38 : vector<32x128xi32>
    %c2146121005_i32 = arith.constant 2146121005 : i32
    %40 = vector.broadcast %c2146121005_i32 : i32 to vector<32x128xi32>
    %41 = arith.muli %39, %40 : vector<32x128xi32>
    %c15_i32 = arith.constant 15 : i32
    %42 = vector.broadcast %c15_i32 : i32 to vector<32x128xi32>
    %43 = arith.shrui %41, %42 : vector<32x128xi32>
    %44 = arith.xori %41, %43 : vector<32x128xi32>
    %c-2073254261_i32 = arith.constant -2073254261 : i32
    %45 = vector.broadcast %c-2073254261_i32 : i32 to vector<32x128xi32>
    %46 = arith.muli %44, %45 : vector<32x128xi32>
    %c16_i32_6 = arith.constant 16 : i32
    %47 = vector.broadcast %c16_i32_6 : i32 to vector<32x128xi32>
    %48 = arith.shrui %46, %47 : vector<32x128xi32>
    %49 = arith.xori %46, %48 : vector<32x128xi32>
    %50 = vector.broadcast %25 : i32 to vector<32x128xi32>
    %51 = arith.cmpi uge, %49, %50 : vector<32x128xi32>
    %cst_7 = arith.constant 0.000000e+00 : f32
    %52 = vector.broadcast %cst_7 : f32 to vector<32x128xf32>
    %53 = arith.select %51, %23, %52 : vector<32x128xi1>, vector<32x128xf32>
    %c0_8 = arith.constant 0 : index
    %c0_9 = arith.constant 0 : index
    %54 = vector.load %arg5[%c0_8, %c0_9] : memref<32x1xf32, #tpu.memory_space<vmem>>, vector<32x1xf32>
    %55 = vector.broadcast %54 : vector<32x1xf32> to vector<32x128xf32>
    %56 = arith.mulf %53, %55 : vector<32x128xf32>
    %cst_10 = arith.constant dense<0.000000e+00> : vector<128xf32>
    %57 = vector.multi_reduction <add>, %56, %cst_10 [0] : vector<32x128xf32> to vector<128xf32>
    %58 = vector.shape_cast %57 : vector<128xf32> to vector<1x128xf32>
    %c0_11 = arith.constant 0 : index
    %c0_12 = arith.constant 0 : index
    %59 = vector.load %arg6[%c0_11, %c0_12] : memref<1x1xf32, #tpu.memory_space<vmem>>, vector<1x1xf32>
    %60 = vector.broadcast %59 : vector<1x1xf32> to vector<1x128xf32>
    %61 = arith.addf %58, %60 : vector<1x128xf32>
    %c0_13 = arith.constant 0 : index
    %c0_14 = arith.constant 0 : index
    %62 = vector.load %arg7[%c0_13, %c0_14] : memref<1x128xf32, #tpu.memory_space<vmem>>, vector<1x128xf32>
    tpu.vector_store %arg7[%c0_13, %c0_14], %61 {strides = array<i32>} : memref<1x128xf32, #tpu.memory_space<vmem>>, vector<1x128xf32>,
    return
  }
  func.func @transform_0(%arg0: i32) -> i32 {
    %c0_i32 = arith.constant 0 : i32
    %c0_i32_0 = arith.constant 0 : i32
    return %c0_i32 : i32
  }
  func.func @transform_1(%arg0: i32) -> (i32, i32) {
    %c0_i32 = arith.constant 0 : i32
    %c0_i32_0 = arith.constant 0 : i32
    return %c0_i32, %arg0 : i32, i32
  }
  func.func @transform_2(%arg0: i32) -> (i32, i32) {
    %c0_i32 = arith.constant 0 : i32
    %c0_i32_0 = arith.constant 0 : i32
    %c0_i32_1 = arith.constant 0 : i32
    return %c0_i32, %c0_i32_0 : i32, i32
  }
  func.func @transform_3(%arg0: i32) -> (i32, i32) {
    %c0_i32 = arith.constant 0 : i32
    %c0_i32_0 = arith.constant 0 : i32
    %c0_i32_1 = arith.constant 0 : i32
    return %c0_i32, %c0_i32_0 : i32, i32
  }
  func.func @transform_4(%arg0: i32) -> (i32, i32) {
    %c0_i32 = arith.constant 0 : i32
    %c0_i32_0 = arith.constant 0 : i32
    %c0_i32_1 = arith.constant 0 : i32
    return %c0_i32, %c0_i32_0 : i32, i32
  }
  func.func @transform_5(%arg0: i32) -> (i32, i32) {
    %c0_i32 = arith.constant 0 : i32
    %c0_i32_0 = arith.constant 0 : i32
    %c0_i32_1 = arith.constant 0 : i32
    return %c0_i32, %c0_i32_0 : i32, i32
  }
  func.func @transform_6(%arg0: i32) -> (i32, i32) {
    %c0_i32 = arith.constant 0 : i32
    %c0_i32_0 = arith.constant 0 : i32
    return %c0_i32, %arg0 : i32, i32
  }
}

</mosaic_0001>

<bundles_post_ra>
// kernel: tpu_custom_call.1
= control target key start
LH: loop header
LB: loop body
LE: loop exit
PB: predicated region body
PF: predicated region fallthrough
CT: control target
= control target key end

     0   :  { %s943_s0 = inlined_call_operand.vmem [shape: s32[2], index: 0, kind: input, shape index: {}]   ;;  %s944_s1 = inlined_call_operand.vmem [shape: f32[3,256], index: 1, kind: input, shape index: {}]   ;;  %s945_s2 = inlined_call_operand.vmem [shape: f32[32,3], index: 2, kind: input, shape index: {}]   ;;  %s946_s3 = inlined_call_operand.vmem [shape: f32[32,1], index: 3, kind: input, shape index: {}]   ;;  %s947_s4 = inlined_call_operand.vmem [shape: f32[32,1], index: 4, kind: input, shape index: {}]   ;;  %s948_s5 = inlined_call_operand.<no memory space> [shape: f32[1,1], index: 5, kind: input, shape index: {}]   ;;  %s949_s6 = inlined_call_operand.hbm [shape: f32[1,256], index: 6, kind: output, shape index: {}]  }
   0x1   :  { %v11_v0 = vstv %s948_s5 }
   0x2   :  { %12 = vst [vmem:[#allocation2] sm:$0x1] %v11_v0 }
   0x3   :  { %13 = vsyncpa [#allocation5], 0 }
   0x4   :  { %14 = vsyncpa [#allocation4], 0 }
   0x5   :  { %16 = vsyncpa [#allocation4 + $0x1], 0  ;;  %s775_s23 = smov 0   ;;  %s777_s24 = smov 0  }
   0x6   :  { %s779_s25 = smov 0   ;;  %s781_s26 = smov 0  }
   0x7 LB: > { %s796_s5 = sadd.s32 4294967295, %s730_s26   ;;  %s576_s27 = sadd.s32 4294967294, %s730_s26   ;;  %s730_s26 = sphi %s781_s26, %s956_s26   ;;  %s726_s25 = sphi %s779_s25, %s955_s25   ;;  %s722_s24 = sphi %s777_s24, %s954_s24   ;;  %s718_s23 = sphi %s775_s23, %s953_s23  }
   0x8   : > { %s800_s28 = sadd.s32 1, %s730_s26   ;;  %s160_s29 = sadd.s32 1, %s726_s25 }
   0x9   : > { %s157_s30 = ssub.s32 %s730_s26, %s800_s28  ;;  %p170_p0 = scmp.ne.s32.totalorder %s726_s25, %s722_s24 }
   0xa   : > { %p158_p1 = scmp.eq.s32.totalorder %s157_s30, 0  ;;  %p171_p2 = scmp.eq.s32.totalorder %s796_s5, 1 }
   0xb   : > { %p176_p3 = scmp.ne.s32.totalorder %s722_s24, %s718_s23  ;;  %p177_p4 = scmp.eq.s32.totalorder %s576_s27, 1 }
   0xc   : > { %s811_s7 = scalar_select %p158_p1, %s726_s25, %s160_s29  }
   0xd   : > { %p813_p5 = por %p171_p2, %p170_p0  ;;  %p817_p6 = por %p177_p4, %p176_p3 }
   0xe   : > { %p577_p7 = scmp.ge.s32.totalorder %s730_s26, 1  ;;  %p184_p8 = scmp.lt.s32.totalorder %s730_s26, 3 }
   0xf   : > { %p602_p9 = scmp.eq.s32.totalorder %s796_s5, 0  ;;  %s197_s13 = sshll.u32 %s943_s0, 4  ;;  %s198_s13 = int_to_ptr.vmem [resolvable:$true] %s197_s13 }
  0x10   : > { %p824_p10 = pnand %p577_p7, %p184_p8  ;;  %s649_s14 = scalar_lea.vmem %s198_s13, 16 }
  0x11   : > { %p650_p13 = scmp.ne.s32.totalorder %s198_s13, %s649_s14  ;;  %p657_p3 = scmp.lt.s32.totalorder %s198_s13, %s198_s13 }
  0x12   : > { %p594_p11 = pneg %p824_p10  ;;  %p658_p4 = scmp.lt.s32.totalorder %s649_s14, %s649_s14 }
  0x14   : > { %p595_p12 = pnand %p602_p9, %p594_p11  ;;  %p659_p7 = por %p658_p4, %p657_p3 }
  0x16   : > { %p651_p0 = pneg %p595_p12 }
  0x18   : > { %p652_p1 = pnand %p651_p0, %p650_p13 }
  0x1a   : > { %p653_p2 = pneg %p652_p1 }
  0x1c   : > { %p660_p8 = pnand %p659_p7, %p653_p2 }
  0x1e   : > { %663 = shalt.err (!%p660_p8)
}
  0x1f   : > { %s732_s15 = smov [#allocation3]   ;;  %229 = sbr.rel (%p824_p10) target bundleno = 249 (0xf9), region = 44 }
  0x20   : > { %597 = dma.vmem_to_smem (!%p595_p12), %s198_s13, 16, %s732_s15, [#allocation5]  }
  0x26   : > { %709 = dma.done.wait (%p602_p9), [#allocation5], 16  }
  0x27   : > { %711 = vsyncadd (%p602_p9), [#allocation5], 4294967280 }
  0x28   : > { %235 = sfence }
  0x29   : > { %v263_v1 = vld [vmem:[%s945_s2] sm:$0xff]  ;;  %v733_v2 = vmov 2   ;;  %v734_v3 = vmov 1   ;;  %v264_v4 = vld [vmem:[%s945_s2 + $0x8] sm:$0xff]  ;;  %v266_v5 = vld [vmem:[%s945_s2 + $0x18] sm:$0xff]  ;;  %v735_v7 = vmov 0   ;;  %v287_v17 = vlaneseq }
  0x2a   : > { %642 = vset.pattern.permute.xlu0 %v733_v2  ;;  %641 = vset.pattern.permute.xlu1 %v734_v3  ;;  %v265_v6 = vld [vmem:[%s945_s2 + $0x10] sm:$0xff]  ;;  %v351_v8 = vld [vmem:[%s946_s3] sm:$0xff]  ;;  %v354_v9 = vld [vmem:[%s946_s3 + $0x18] sm:$0xff]  ;;  %s584_s29 = sshll.u32 %s796_s5, 7  ;;  %s383_s30 = sld [smem:[#allocation3]] }
  0x2b   : > { %324 = vperm.xlu0 %642, %v263_v1   ;;  %296 = vperm.xlu1 %641, %v263_v1   ;;  %v448_v10 = vld [vmem:[%s947_s4 + $0x8] sm:$0xff]  ;;  %v450_v12 = vld [vmem:[%s947_s4 + $0x18] sm:$0xff]  ;;  %v353_v13 = vld [vmem:[%s946_s3 + $0x10] sm:$0xff]  ;;  %v391_v18 = vand.u32 127, %v287_v17  ;;  %v393_v19 = vstv %s584_s29  ;;  %v878_v21 = vshrl.u32 %v287_v17, 7  ;;  %p258_p9 = scmp.lt.s32.totalorder %s796_s5, 1 }
  0x2c   : > { %v352_v11 = vld [vmem:[%s946_s3 + $0x8] sm:$0xff]  ;;  %v447_v14 = vld [vmem:[%s947_s4] sm:$0xff]  ;;  %v449_v15 = vld [vmem:[%s947_s4 + $0x10] sm:$0xff]  ;;  %s583_s16 = sld [smem:[#allocation3 + $0x1]]  ;;  %s256_s17 = sand.u32 1, %s722_s24  }
  0x2d   : > { %v484_v16 = vld [vmem:[#allocation2] sm:$0x1]  ;;  %v394_v20 = vadd.s32 %v393_v19, %v391_v18  ;;  %v387_v23 = vadd.s32 8, %v878_v21  ;;  %v389_v24 = vadd.s32 24, %v878_v21  ;;  %v388_v28 = vadd.s32 16, %v878_v21  ;;  %s259_s11 = scalar_select %p258_p9, %s796_s5, 1 }
  0x2e   : > { %v289_v52 = vsub.s32 0, %v878_v21  ;;  %v313_v53 = vsub.s32 1, %v878_v21  ;;  %v341_v60 = vsub.s32 2, %v878_v21  ;;  %s585_s18 = sshll.u32 %s796_s5, 4  ;;  %s257_s19 = scalar_lea.vmem [#allocation6], %s256_s17 }
  0x2f   : > { %645 = vset.pattern.permute.xlu0 %v734_v3  ;;  %300 = vperm.xlu1 %641, %v264_v4   ;;  %v395_v22 = vmul.u32 32, %v394_v20  ;;  %s582_s12 = sshll.u32 %s259_s11, 2  ;;  %s509_s20 = sshll.u32 %s257_s19, 4  ;;  %s903_s20 = int_to_ptr.vmem [resolvable:$true] %s509_s20 }
  0x30   : > { %308 = vperm.xlu0 %645, %v266_v5   ;;  %s400_s10 = smul.u32 2654435761, %s383_s30  ;;  %s261_s15 = scalar_lea.vmem %s944_s1, %s582_s12 }
  0x31   : > { %v396_v25 = vadd.s32 %v395_v22, %v878_v21  ;;  %v397_v26 = vadd.s32 %v395_v22, %v387_v23  ;;  %v399_v31 = vadd.s32 %v395_v22, %v389_v24  ;;  %v398_v34 = vadd.s32 %v395_v22, %v388_v28  ;;  %v262_v57 = vld [vmem:[%s261_s15] sm:$0x7]  ;;  %s901_s27 = scalar_lea.hbm %s949_s6, %s585_s18  ;;  %s497_s29 = scalar_lea.sflag [#allocation4], %s256_s17 }
  0x32   : > { %v401_v27 = vstv %s400_s10  ;;  %v290_v61 = vrot.slane %v262_v57, %v289_v52  ;;  %v314_v63 = vrot.slane %v262_v57, %v313_v53  ;;  %s664_s5 = scalar_lea.vmem %s903_s20, 16  ;;  %s736_s30 = smov [#allocation6]  }
  0x33   : > { %304 = vperm.xlu1 %641, %v265_v6   ;;  %v402_v32 = vxor.u32 %v401_v27, %v396_v25  ;;  %v403_v33 = vxor.u32 %v401_v27, %v397_v26  ;;  %v405_v36 = vxor.u32 %v401_v27, %v399_v31  ;;  %v404_v40 = vxor.u32 %v401_v27, %v398_v34  ;;  %p665_p10 = scmp.ne.s32.totalorder %s903_s20, %s664_s5  ;;  %s668_s10 = sshll.u32 %s736_s30, 4  ;;  %s669_s10 = int_to_ptr.vmem [resolvable:$false] %s668_s10 }
  0x34   : > { %646 = vset.pattern.permute.xlu0 %v735_v7  ;;  %s670_s11 = scalar_lea.vmem %s669_s10, 32  ;;  %p671_p13 = scmp.lt.s32.totalorder %s903_s20, %s669_s10 }
  0x35   : > { %269 = vperm.xlu0 %646, %v263_v1   ;;  %v406_v37 = vshrl.u32 %v402_v32, 16  ;;  %v407_v39 = vshrl.u32 %v403_v33, 16  ;;  %v409_v42 = vshrl.u32 %v405_v36, 16  ;;  %v408_v45 = vshrl.u32 %v404_v40, 16  ;;  %p666_p11 = pnand %p665_p10, %p813_p5  ;;  %p672_p0 = scmp.lt.s32.totalorder %s670_s11, %s664_s5 }
  0x37   : > { %643 = vset.pattern.permute.xlu1 %v733_v2  ;;  %v410_v43 = vxor.u32 %v406_v37, %v402_v32  ;;  %v411_v44 = vxor.u32 %v407_v39, %v403_v33  ;;  %v413_v47 = vxor.u32 %v409_v42, %v405_v36  ;;  %v412_v51 = vxor.u32 %v408_v45, %v404_v40  ;;  %p667_p12 = pneg %p666_p11  ;;  %p673_p1 = por %p672_p0, %p671_p13 }
  0x38   : > { %328 = vperm.xlu1 %643, %v264_v4  }
  0x39   : > { %274 = vperm.xlu0 %646, %v264_v4   ;;  %v414_v48 = vmul.u32 2146121005, %v410_v43  ;;  %v415_v50 = vmul.u32 2146121005, %v411_v44  ;;  %v342_v4 = vrot.slane %v262_v57, %v341_v60  ;;  %p674_p2 = pnand %p673_p1, %p667_p12 }
  0x3a   : > { %v417_v55 = vmul.u32 2146121005, %v413_v47  ;;  %v416_v59 = vmul.u32 2146121005, %v412_v51 }
  0x3b   : > { %v418_v56 = vshrl.u32 %v414_v48, 15  ;;  %v419_v58 = vshrl.u32 %v415_v50, 15 }
  0x3c   : > { %644 = vset.pattern.permute.xlu1 %v735_v7  ;;  %v421_v0 = vshrl.u32 %v417_v55, 15  ;;  %v420_v3 = vshrl.u32 %v416_v59, 15 }
  0x3d   : > { %279 = vperm.xlu0 %646, %v265_v6   ;;  %284 = vperm.xlu1 %644, %v266_v5   ;;  %v422_v1 = vxor.u32 %v418_v56, %v414_v48 }
  0x41   : > { %357 = vperm.xlu0 %646, %v351_v8   ;;  %647 = vset.pattern.permute.xlu1 %v733_v2  ;;  %v423_v2 = vxor.u32 %v419_v58, %v415_v50 }
  0x42   : > { %332 = vperm.xlu1 %647, %v265_v6  }
  0x45   : > { %372 = vperm.xlu0 %646, %v354_v9  }
  0x46   : > { %336 = vperm.xlu1 %647, %v266_v5  }
  0x49   : > { %458 = vperm.xlu0 %646, %v448_v10   ;;  %v425_v10 = vxor.u32 %v421_v0, %v417_v55 }
  0x4a   : > { %648 = vset.pattern.permute.xlu1 %v735_v7 }
  0x4b   : > { %362 = vperm.xlu1 %648, %v352_v11   ;;  %v426_v11 = vmul.u32 2221713035, %v422_v1  ;;  %v429_v24 = vmul.u32 2221713035, %v425_v10 }
  0x4d   : > { %468 = vperm.xlu0 %646, %v450_v12   ;;  %v430_v25 = vshrl.u32 %v426_v11, 16  ;;  %v433_v39 = vshrl.u32 %v429_v24, 16 }
  0x4f   : > { %367 = vperm.xlu1 %648, %v353_v13   ;;  %v427_v13 = vmul.u32 2221713035, %v423_v2  ;;  %v434_v40 = vxor.u32 %v430_v25, %v426_v11 }
  0x51   : > { %v431_v28 = vshrl.u32 %v427_v13, 16 }
  0x53   : > { %453 = vperm.xlu1 %648, %v447_v14   ;;  %v424_v14 = vxor.u32 %v420_v3, %v416_v59  ;;  %v435_v43 = vxor.u32 %v431_v28, %v427_v13 }
  0x55   : > { %v428_v31 = vmul.u32 2221713035, %v424_v14 }
  0x57   : > { %463 = vperm.xlu1 %648, %v449_v15   ;;  %v432_v45 = vshrl.u32 %v428_v31, 16 }
  0x5b   : > { %487 = vperm.xlu1 %648, %v484_v16  }
  0xaa   : > { %v297_v29 = vpop.permute.xlu1 %296  ;;  %v325_v30 = vpop.permute.xlu0 %324 }
  0xab   : > { %v315_v9 = vmul.f32 %v314_v63, %v297_v29  ;;  %v343_v15 = vmul.f32 %v342_v4, %v325_v30 }
  0xae   : > { %v301_v35 = vpop.permute.xlu1 %300 }
  0xaf   : > { %v309_v38 = vpop.permute.xlu0 %308  ;;  %v316_v12 = vmul.f32 %v314_v63, %v301_v35  ;;  %v438_v35 = vstv %s583_s16 }
  0xb0   : > { %v318_v16 = vmul.f32 %v314_v63, %v309_v38  ;;  %vm439_vm0 = vcmp.ge.u32.totalorder %v434_v40, %v438_v35  ;;  %vm440_vm1 = vcmp.ge.u32.totalorder %v435_v43, %v438_v35 }
  0xb2   : > { %v305_v41 = vpop.permute.xlu1 %304 }
  0xb3   : > { %v317_v33 = vmul.f32 %v314_v63, %v305_v41  ;;  %v437_v41 = vxor.u32 %v433_v39, %v429_v24 }
  0xb4   : > { %v270_v46 = vpop.permute.xlu0 %269 }
  0xb5   : > { %v291_v5 = vmul.f32 %v290_v61, %v270_v46  ;;  %vm442_vm2 = vcmp.ge.u32.totalorder %v437_v41, %v438_v35 }
  0xb7   : > { %v329_v49 = vpop.permute.xlu1 %328  ;;  %v319_v17 = vadd.f32 %v315_v9, %v291_v5 }
  0xb8   : > { %v275_v54 = vpop.permute.xlu0 %274  ;;  %v344_v26 = vmul.f32 %v342_v4, %v329_v49 }
  0xb9   : > { %v292_v7 = vmul.f32 %v290_v61, %v275_v54  ;;  %v347_v32 = vadd.f32 %v343_v15, %v319_v17  ;;  %v436_v54 = vxor.u32 %v432_v45, %v428_v31 }
  0xbb   : > { %v320_v19 = vadd.f32 %v316_v12, %v292_v7  ;;  %vm441_vm3 = vcmp.ge.u32.totalorder %v436_v54, %v438_v35 }
  0xbc   : > { %v285_v62 = vpop.permute.xlu1 %284  ;;  %v280_v6 = vpop.permute.xlu0 %279 }
  0xbd   : > { %v294_v18 = vmul.f32 %v290_v61, %v285_v62  ;;  %v293_v27 = vmul.f32 %v290_v61, %v280_v6  ;;  %v348_v36 = vadd.f32 %v344_v26, %v320_v19 }
  0xbf   : > { %v322_v29 = vadd.f32 %v318_v16, %v294_v18  ;;  %v321_v42 = vadd.f32 %v317_v33, %v293_v27 }
  0xc0   : > { %v358_v22 = vpop.permute.xlu0 %357 }
  0xc1   : > { %v333_v8 = vpop.permute.xlu1 %332  ;;  %v375_v30 = vadd.f32 %v358_v22, %v347_v32 }
  0xc2   : > { %v345_v34 = vmul.f32 %v342_v4, %v333_v8 }
  0xc3   : > { %v379_v48 = vmax.f32 %v375_v30, 0.0 }
  0xc4   : > { %v373_v46 = vpop.permute.xlu0 %372  ;;  %v349_v47 = vadd.f32 %v345_v34, %v321_v42 }
  0xc5   : > { %v337_v20 = vpop.permute.xlu1 %336  ;;  %v443_v60 = vsel %vm439_vm0, %v379_v48, 0.0 }
  0xc6   : > { %v346_v23 = vmul.f32 %v342_v4, %v337_v20 }
  0xc8   : > { %v350_v37 = vadd.f32 %v346_v23, %v322_v29  ;;  %v459_v55 = vpop.permute.xlu0 %458 }
  0xca   : > { %v363_v38 = vpop.permute.xlu1 %362  ;;  %v378_v50 = vadd.f32 %v373_v46, %v350_v37 }
  0xcb   : > { %v376_v44 = vadd.f32 %v363_v38, %v348_v36 }
  0xcc   : > { %v382_v57 = vmax.f32 %v378_v50, 0.0  ;;  %v469_v4 = vpop.permute.xlu0 %468 }
  0xcd   : > { %v380_v49 = vmax.f32 %v376_v44, 0.0 }
  0xce   : > { %v368_v51 = vpop.permute.xlu1 %367  ;;  %v446_v63 = vsel %vm442_vm2, %v382_v57, 0.0 }
  0xcf   : > { %v377_v53 = vadd.f32 %v368_v51, %v349_v47  ;;  %v444_v56 = vsel %vm440_vm1, %v380_v49, 0.0  ;;  %v474_v5 = vmul.f32 %v469_v4, %v446_v63 }
  0xd0   : > { %v472_v62 = vmul.f32 %v459_v55, %v444_v56 }
  0xd1   : > { %v381_v58 = vmax.f32 %v377_v53, 0.0 }
  0xd2   : > { %v454_v59 = vpop.permute.xlu1 %453 }
  0xd3   : > { %v471_v61 = vmul.f32 %v454_v59, %v443_v60  ;;  %v445_v1 = vsel %vm441_vm3, %v381_v58, 0.0 }
  0xd5   : > { %v475_v2 = vadd.f32 %v472_v62, %v471_v61 }
  0xd6   : > { %v464_v0 = vpop.permute.xlu1 %463 }
  0xd7   : > { %v473_v3 = vmul.f32 %v464_v0, %v445_v1 }
  0xd9   : > { %v476_v6 = vadd.f32 %v475_v2, %v473_v3 }
  0xda   : > { %v488_v12 = vpop.permute.xlu1 %487 }
  0xdb   : > { %v477_v7 = vadd.f32 %v476_v6, %v474_v5  ;;  %v493_v15 = vrot.slane %v488_v12, %v289_v52 }
  0xdd   : > { %v478_v8 = vrot.slane %v477_v7, 4 }
  0xdf   : > { %v479_v9 = vadd.f32 %v478_v8, %v477_v7 }
  0xe1   : > { %v480_v10 = vrot.slane %v479_v9, 2 }
  0xe3   : > { %v481_v11 = vadd.f32 %v480_v10, %v479_v9 }
  0xe5   : > { %v482_v13 = vrot.slane %v481_v11, 1 }
  0xe7   : > { %v483_v14 = vadd.f32 %v482_v13, %v481_v11 }
  0xe9   : > { %v494_v16 = vadd.f32 %v493_v15, %v483_v14 }
  0xeb   : > { %495 = vst [vmem:[%s257_s19] sm:$0x1] %v494_v16 }
  0xec   : > { %677 = shalt.err (!%p674_p2)
}
  0xed   : > { %s678_s12 = scalar_lea.hbm %s901_s27, 16  ;;  %s682_s15 = scalar_lea.hbm %s949_s6, 32 }
  0xee   : > { %p679_p3 = scmp.ne.s32.totalorder %s901_s27, %s678_s12  ;;  %p683_p8 = scmp.lt.u32.totalorder %s901_s27, %s949_s6 }
  0xef   : > { %p684_p9 = scmp.lt.u32.totalorder %s682_s15, %s678_s12  ;;  %p686_p11 = scmp.lt.u32.totalorder %s678_s12, %s901_s27 }
  0xf0   : > { %p680_p4 = pnand %p679_p3, %p813_p5 }
  0xf1   : > { %p685_p10 = por %p684_p9, %p683_p8 }
  0xf2   : > { %p681_p7 = pneg %p680_p4 }
  0xf3   : > { %p687_p12 = por %p686_p11, %p685_p10 }
  0xf5   : > { %p688_p13 = pnand %p687_p12, %p681_p7 }
  0xf7   : > { %691 = shalt.err (!%p688_p13)
}
  0xf8   : > { %592 = dma.vmem_to_hbm [thread:$0]  (%p813_p5), %s903_s20, 16, %s901_s27, %s497_s29  }
  0xf9 PF: > { %p604_p0 = scmp.ge.s32.totalorder %s730_s26, 2  ;;  %s521_s18 = sand.u32 1, %s718_s23  }
  0xfa   : > { %s522_s19 = scalar_lea.sflag [#allocation4], %s521_s18 }
  0xfb   : > { %p599_p1 = pnand %p604_p0, %p817_p6 }
  0xfd   : > { %713 = dma.done.wait (!%p599_p1), %s522_s19, 16  }
  0xfe   : > { %715 = vsyncadd (!%p599_p1), %s522_s19, 4294967280  ;;  %p19_p2 = scmp.ge.s32.totalorder %s800_s28, 4   ;;  %s953_s23 = smov %s722_s24 }
  0xff   : > { %s954_s24 = smov %s726_s25  ;;  %s955_s25 = smov %s811_s7 }
 0x100   : > { %s956_s26 = smov %s800_s28  ;;  %21 = sbr.rel (!%p19_p2) target bundleno = 7 (0x7), region = 84 }
 0x107   :  { %526 = vsyncpa [#allocation4], 1 }
 0x108   :  { %528 = vsyncpa [#allocation4 + $0x1], 1 }
 0x109   :  { %529 = vsyncpa [#allocation5], 1 }
 0x10a   :  { %531 = vsyncpa [#allocation5 + $0x1], 1 }

</bundles_post_ra>
